<compile_context>
chip_gen: v7x
topology: tpu7x:2x2x1
jax: 0.10.0
libtpu: 0.0.40
codegen_flags: <defaults>
</compile_context>

<pallas_src>
import jax
import jax.numpy as jnp
import numpy as np
from jax.experimental import pallas as pl
from jax.experimental.pallas import tpu as pltpu

P_DROP = 0.1
BN_EPS = 1e-5
INV_KEEP = 1.0 / (1.0 - P_DROP)
# keep iff bits < round((1-p) * 2**32).  Keep probability is (1-p) to within
# 2**-32 while the scale is exactly 1/(1-p) -- negligible, documented bias.
_KEEP_THRESHOLD = np.uint32(int(round((1.0 - P_DROP) * (1 << 32))))


# --------------------------------------------------------------------------
# Kernel bodies
# --------------------------------------------------------------------------
def _bn_relu_dropout(h, gamma, beta, keep):
    """h: [B, TN] f32 matmul result; gamma/beta: [1, TN] f32; keep: [B, TN] bool."""
    inv_b = 1.0 / h.shape[0]
    mean = jnp.sum(h, axis=0, keepdims=True) * inv_b              # [1, TN]
    c = h - mean                                                  # two-pass (centered)
    var = jnp.sum(c * c, axis=0, keepdims=True) * inv_b           # variance: no cancel
    # Fold the inverted-dropout scale into the BN affine (positive factor
    # commutes with ReLU), so dropout below is a bare select.
    scale = gamma * jax.lax.rsqrt(var + BN_EPS) * INV_KEEP        # rsqrt -> EUP slot
    shift = beta * INV_KEEP                                       # [1, TN] row ops only
    y = jnp.maximum(c * scale + shift, 0.0)                       # BN + ReLU, one pass
    return jnp.where(keep, y, 0.0)                                # dropout


def _dropout_block_kernel_prng(seed_ref, x_ref, w_ref, gamma_ref, beta_ref, o_ref):
    # In-kernel dropout mask: no HBM bit stream, no extra VMEM buffer.
    pltpu.prng_seed(seed_ref[0] + pl.program_id(0))
    bits = pltpu.bitcast(pltpu.prng_random_bits(o_ref.shape), jnp.uint32)
    # Linear (bias omitted: cancels under training-mode BN).  bf16 operands,
    # f32 accumulation on the MXU.
    h = jnp.dot(x_ref[...], w_ref[...], preferred_element_type=jnp.float32)
    out = _bn_relu_dropout(h, gamma_ref[...], beta_ref[...], bits < _KEEP_THRESHOLD)
    o_ref[...] = out.astype(o_ref.dtype)


def _dropout_block_kernel_hostbits(x_ref, w_ref, gamma_ref, beta_ref, bits_ref, o_ref):
    h = jnp.dot(x_ref[...], w_ref[...], preferred_element_type=jnp.float32)
    out = _bn_relu_dropout(h, gamma_ref[...], beta_ref[...],
                           bits_ref[...] < _KEEP_THRESHOLD)
    o_ref[...] = out.astype(o_ref.dtype)


# --------------------------------------------------------------------------
# Spec / sizing helpers
# --------------------------------------------------------------------------
def _invariant_x_spec(block_shape):
    index_map = lambda j: (0, 0)
    try:
        # X never changes across the feature grid: single-buffer it (a second
        # pipeline buffer would be pure VMEM waste).
        return pl.BlockSpec(block_shape, index_map, pipeline_mode=pl.Buffered(1))
    except Exception:  # BlockSpec without pipeline_mode support
        return pl.BlockSpec(block_shape, index_map)


def _vmem_budget_bytes():
    capacity = 64 * 1024 * 1024  # conservative default: v7x per-core VMEM
    try:
        capacity = int(getattr(pltpu.get_tpu_info(), "vmem_capacity_bytes", capacity))
    except Exception:
        pass
    return max(int(capacity * 3 // 4), 32 * 1024 * 1024)


def _pick_tile(batch, in_units, out_units, budget_bytes):
    def footprint(tn):
        x_b = batch * in_units * 2            # bf16 X, single-buffered, resident
        w_b = 2 * in_units * tn * 2           # bf16 W tile, double-buffered
        gb_b = 2 * 2 * tn * 4                 # gamma/beta tiles
        out_b = 2 * batch * tn * 4            # f32 output tile, double-buffered
        bits_b = 2 * batch * tn * 4           # host-bits fallback worst case
        tmp_b = 2 * batch * tn * 4            # in-kernel f32 temporaries headroom
        return x_b + w_b + gb_b + out_b + bits_b + tmp_b

    candidates = [c for c in (2048, 1024, 512, 256, 128) if out_units % c == 0]
    fitting = [c for c in candidates if footprint(c) <= budget_bytes]
    # Prefer >= 2 feature tiles so the "parallel" axis can shard across v7x's
    # two TensorCores, then the largest tile that fits the VMEM budget.
    for c in fitting:
        if out_units // c >= 2:
            return c
    if fitting:
        return fitting[0]
    if candidates:
        return candidates[-1]
    return out_units  # small / irregular width: single whole-width tile


# --------------------------------------------------------------------------
# One-time capability probe: in-kernel PRNG (+ single-buffered invariant input)
# --------------------------------------------------------------------------
_FAST_PATH_OK = None


def _fast_path_probe_kernel(seed_ref, x_ref, o_ref):
    pltpu.prng_seed(seed_ref[0] + pl.program_id(0))
    bits = pltpu.bitcast(pltpu.prng_random_bits(o_ref.shape), jnp.uint32)
    o_ref[...] = jnp.where(bits < _KEEP_THRESHOLD, x_ref[...], 0.0)


def _fast_path_available():
    """Probe whether the optimized path lowers in this environment; otherwise
    fall back to host-generated dropout bits (e.g. interpret mode)."""
    global _FAST_PATH_OK
    if _FAST_PATH_OK is None:
        try:
            out = pl.pallas_call(
                _fast_path_probe_kernel,
                out_shape=jax.ShapeDtypeStruct((8, 256), jnp.float32),
                grid=(2,),
                in_specs=[
                    pl.BlockSpec(memory_space=pltpu.MemorySpace.SMEM),
                    _invariant_x_spec((8, 128)),
                ],
                out_specs=pl.BlockSpec((8, 128), lambda j: (0, j)),
            )(jnp.zeros((1,), jnp.int32), jnp.ones((8, 128), jnp.float32))
            jax.block_until_ready(out)
            _FAST_PATH_OK = True
        except Exception:
            _FAST_PATH_OK = False
    return _FAST_PATH_OK


# --------------------------------------------------------------------------
# Public wrapper
# --------------------------------------------------------------------------
def dropout_block(x, w, b, gamma, beta, key, *,
                  out_dtype=jnp.float32, mxu_dtype=jnp.bfloat16):
    """Training-mode forward of DropoutBlock.

    x: [B, in_units]; w: [in_units, out_units]; b/gamma/beta: [out_units].
    `b` (Linear bias) is accepted for API parity but unused: a constant
    per-feature shift before training-mode BatchNorm cancels in (h - mean(h)).
    Set out_dtype=jnp.bfloat16 to halve writeback traffic if the consumer
    tolerates it.
    """
    del b
    batch, in_units = x.shape
    out_units = w.shape[1]

    budget = _vmem_budget_bytes()
    tn = _pick_tile(batch, in_units, out_units, budget)
    grid = (out_units // tn,)

    x_mx = x.astype(mxu_dtype)        # MXU is bf16-native; accumulation stays f32
    w_mx = w.astype(mxu_dtype)
    g2 = gamma.reshape(1, out_units).astype(jnp.float32)
    b2 = beta.reshape(1, out_units).astype(jnp.float32)

    compiler_params = pltpu.CompilerParams(
        dimension_semantics=("parallel",),
        vmem_limit_bytes=budget,
    )
    w_spec = pl.BlockSpec((in_units, tn), lambda j: (0, j))
    vec_spec = pl.BlockSpec((1, tn), lambda j: (0, j))
    out_spec = pl.BlockSpec((batch, tn), lambda j: (0, j))
    out_shape = jax.ShapeDtypeStruct((batch, out_units), out_dtype)

    # TODO(synk): for very large batch*in_units (X residency approaching the
    # VMEM budget, mainly v7x 64 MiB), add an in_units grid axis ("arbitrary")
    # with a (batch, tn) f32 accumulator and run BN/ReLU/dropout in a final-k
    # pl.when epilogue.

    if _fast_path_available():
        seed = jax.random.randint(key, (1,), 0, jnp.iinfo(jnp.int32).max,
                                  dtype=jnp.int32)
        return pl.pallas_call(
            _dropout_block_kernel_prng,
            out_shape=out_shape,
            grid=grid,
            in_specs=[
                pl.BlockSpec(memory_space=pltpu.MemorySpace.SMEM),  # seed scalar
                _invariant_x_spec((batch, in_units)),               # X: resident
                w_spec, vec_spec, vec_spec,
            ],
            out_specs=out_spec,
            compiler_params=compiler_params,
        )(seed, x_mx, w_mx, g2, b2)

    # Portable fallback: host-generated dropout bits (works in interpret mode).
    bits = jax.random.bits(key, (batch, out_units), dtype=jnp.uint32)
    return pl.pallas_call(
        _dropout_block_kernel_hostbits,
        out_shape=out_shape,
        grid=grid,
        in_specs=[
            pl.BlockSpec((batch, in_units), lambda j: (0, 0)),      # X: resident
            w_spec, vec_spec, vec_spec,
            pl.BlockSpec((batch, tn), lambda j: (0, j)),            # dropout bits
        ],
        out_specs=out_spec,
        compiler_params=compiler_params,
    )(x_mx, w_mx, g2, b2, bits)


if __name__ == "__main__":
    B, IN_UNITS, OUT_UNITS = 8, 32, 128

    key = jax.random.PRNGKey(0)
    kx, kw, kb, kdrop = jax.random.split(key, 4)

    x = jax.random.normal(kx, (B, IN_UNITS), dtype=jnp.float32)
    bound = 1.0 / (IN_UNITS ** 0.5)
    w = jax.random.uniform(kw, (IN_UNITS, OUT_UNITS), jnp.float32, -bound, bound)
    b = jax.random.uniform(kb, (OUT_UNITS,), jnp.float32, -bound, bound)
    gamma = jnp.ones((OUT_UNITS,), jnp.float32)   # BatchNorm1d default weight
    beta = jnp.zeros((OUT_UNITS,), jnp.float32)   # BatchNorm1d default bias

    out = dropout_block(x, w, b, gamma, beta, kdrop)
    jax.block_until_ready(out)

    assert out.shape == (B, OUT_UNITS)
    assert out.dtype == jnp.float32
    assert bool(jnp.all(jnp.isfinite(out)))
    # TODO(synk): BatchNorm1d running_mean/running_var updates are not produced
    # (forward activation only); if added later, the dropped Linear bias must be
    # re-included in the running-statistics accumulation and in eval mode.
    print("KERNEL_OK")
</pallas_src>

<mosaic_0001>
module attributes {stable_mosaic.version = 11 : i64} {
  func.func @_fast_path_probe_kernel(%arg0: i32, %arg1: memref<1xi32, #tpu.memory_space<smem>>, %arg2: memref<8x128xf32, #tpu.memory_space<vmem>>, %arg3: memref<8x128xf32, #tpu.memory_space<vmem>>) attributes {dimension_semantics = [#tpu.dimension_semantics<arbitrary>], iteration_bounds = array<i64: 2>, scalar_prefetch = 0 : i64, scratch_operands = 0 : i64, tpu.core_type = #tpu.core_type<tc>, window_params = [{transform_indices = @transform_0, window_bounds = array<i64: 1>}, {pipeline_mode = #tpu.pipeline_mode<synchronous>, transform_indices = @transform_1, window_bounds = array<i64: 8, 128>}, {transform_indices = @transform_2, window_bounds = array<i64: 8, 128>}]} {
    %c0 = arith.constant 0 : index
    %0 = memref.load %arg1[%c0] : memref<1xi32, #tpu.memory_space<smem>>
    %1 = arith.addi %0, %arg0 : i32
    "tpu.prng_set_seed_32"(%1) : (i32) -> ()
    %2 = "tpu.prng_random_bits"() : () -> vector<8x128xi32>
    %3 = tpu.bitcast %2 : vector<8x128xi32> -> vector<8x128xi32>
    %c-429496730_i32 = arith.constant -429496730 : i32
    %4 = vector.broadcast %c-429496730_i32 : i32 to vector<8x128xi32>
    %5 = arith.cmpi ult, %3, %4 : vector<8x128xi32>
    %c0_0 = arith.constant 0 : index
    %c0_1 = arith.constant 0 : index
    %6 = vector.load %arg2[%c0_0, %c0_1] : memref<8x128xf32, #tpu.memory_space<vmem>>, vector<8x128xf32>
    %cst = arith.constant 0.000000e+00 : f32
    %7 = vector.broadcast %cst : f32 to vector<8x128xf32>
    %8 = arith.select %5, %6, %7 : vector<8x128xi1>, vector<8x128xf32>
    %c0_2 = arith.constant 0 : index
    %c0_3 = arith.constant 0 : index
    %9 = vector.load %arg3[%c0_2, %c0_3] : memref<8x128xf32, #tpu.memory_space<vmem>>, vector<8x128xf32>
    tpu.vector_store %arg3[%c0_2, %c0_3], %8 {strides = array<i32>} : memref<8x128xf32, #tpu.memory_space<vmem>>, vector<8x128xf32>,
    return
  }
  func.func @transform_0(%arg0: i32) -> i32 {
    %c0_i32 = arith.constant 0 : i32
    %c0_i32_0 = arith.constant 0 : i32
    return %c0_i32 : i32
  }
  func.func @transform_1(%arg0: i32) -> (i32, i32) {
    %c0_i32 = arith.constant 0 : i32
    %c0_i32_0 = arith.constant 0 : i32
    %c0_i32_1 = arith.constant 0 : i32
    return %c0_i32, %c0_i32_0 : i32, i32
  }
  func.func @transform_2(%arg0: i32) -> (i32, i32) {
    %c0_i32 = arith.constant 0 : i32
    %c0_i32_0 = arith.constant 0 : i32
    return %c0_i32, %arg0 : i32, i32
  }
}

module attributes {stable_mosaic.version = 11 : i64} {
  func.func @_dropout_block_kernel_hostbits(%arg0: i32, %arg1: memref<8x32xbf16, #tpu.memory_space<vmem>>, %arg2: memref<32x128xbf16, #tpu.memory_space<vmem>>, %arg3: memref<1x128xf32, #tpu.memory_space<vmem>>, %arg4: memref<1x128xf32, #tpu.memory_space<vmem>>, %arg5: memref<8x128xi32, #tpu.memory_space<vmem>>, %arg6: memref<8x128xf32, #tpu.memory_space<vmem>>) attributes {dimension_semantics = [#tpu.dimension_semantics<parallel>], iteration_bounds = array<i64: 1>, scalar_prefetch = 0 : i64, scratch_operands = 0 : i64, tpu.core_type = #tpu.core_type<tc>, window_params = [{pipeline_mode = #tpu.pipeline_mode<synchronous>, transform_indices = @transform_0, window_bounds = array<i64: 8, 32>}, {transform_indices = @transform_1, window_bounds = array<i64: 32, 128>}, {transform_indices = @transform_2, window_bounds = array<i64: 1, 128>}, {transform_indices = @transform_3, window_bounds = array<i64: 1, 128>}, {transform_indices = @transform_4, window_bounds = array<i64: 8, 128>}, {transform_indices = @transform_5, window_bounds = array<i64: 8, 128>}]} {
    %c0 = arith.constant 0 : index
    %c0_0 = arith.constant 0 : index
    %0 = vector.load %arg1[%c0, %c0_0] : memref<8x32xbf16, #tpu.memory_space<vmem>>, vector<8x32xbf16>
    %c0_1 = arith.constant 0 : index
    %c0_2 = arith.constant 0 : index
    %1 = vector.load %arg2[%c0_1, %c0_2] : memref<32x128xbf16, #tpu.memory_space<vmem>>, vector<32x128xbf16>
    %cst = arith.constant dense<0.000000e+00> : vector<8x128xf32>
    %2 = tpu.matmul %0, %1, %cst {dimension_numbers = #tpu.dot_dimension_numbers<[1], [0], [0], [1], [0, 0, 1, 1], [], []>} : vector<8x32xbf16>, vector<32x128xbf16>, vector<8x128xf32> -> vector<8x128xf32>
    %c0_3 = arith.constant 0 : index
    %c0_4 = arith.constant 0 : index
    %3 = vector.load %arg3[%c0_3, %c0_4] : memref<1x128xf32, #tpu.memory_space<vmem>>, vector<1x128xf32>
    %c0_5 = arith.constant 0 : index
    %c0_6 = arith.constant 0 : index
    %4 = vector.load %arg4[%c0_5, %c0_6] : memref<1x128xf32, #tpu.memory_space<vmem>>, vector<1x128xf32>
    %c0_7 = arith.constant 0 : index
    %c0_8 = arith.constant 0 : index
    %5 = vector.load %arg5[%c0_7, %c0_8] : memref<8x128xi32, #tpu.memory_space<vmem>>, vector<8x128xi32>
    %c-429496730_i32 = arith.constant -429496730 : i32
    %6 = vector.broadcast %c-429496730_i32 : i32 to vector<8x128xi32>
    %7 = arith.cmpi ult, %5, %6 : vector<8x128xi32>
    %cst_9 = arith.constant dense<0.000000e+00> : vector<128xf32>
    %8 = vector.multi_reduction <add>, %2, %cst_9 [0] : vector<8x128xf32> to vector<128xf32>
    %9 = vector.shape_cast %8 : vector<128xf32> to vector<1x128xf32>
    %cst_10 = arith.constant 1.250000e-01 : f32
    %10 = vector.broadcast %cst_10 : f32 to vector<1x128xf32>
    %11 = arith.mulf %9, %10 : vector<1x128xf32>
    %12 = vector.broadcast %11 : vector<1x128xf32> to vector<8x128xf32>
    %13 = arith.subf %2, %12 : vector<8x128xf32>
    %14 = arith.mulf %13, %13 : vector<8x128xf32>
    %cst_11 = arith.constant dense<0.000000e+00> : vector<128xf32>
    %15 = vector.multi_reduction <add>, %14, %cst_11 [0] : vector<8x128xf32> to vector<128xf32>
    %16 = vector.shape_cast %15 : vector<128xf32> to vector<1x128xf32>
    %cst_12 = arith.constant 1.250000e-01 : f32
    %17 = vector.broadcast %cst_12 : f32 to vector<1x128xf32>
    %18 = arith.mulf %16, %17 : vector<1x128xf32>
    %cst_13 = arith.constant 9.99999974E-6 : f32
    %19 = vector.broadcast %cst_13 : f32 to vector<1x128xf32>
    %20 = arith.addf %18, %19 : vector<1x128xf32>
    %21 = math.rsqrt %20 : vector<1x128xf32>
    %22 = arith.mulf %3, %21 : vector<1x128xf32>
    %cst_14 = arith.constant 1.11111116 : f32
    %23 = vector.broadcast %cst_14 : f32 to vector<1x128xf32>
    %24 = arith.mulf %22, %23 : vector<1x128xf32>
    %cst_15 = arith.constant 1.11111116 : f32
    %25 = vector.broadcast %cst_15 : f32 to vector<1x128xf32>
    %26 = arith.mulf %4, %25 : vector<1x128xf32>
    %27 = vector.broadcast %24 : vector<1x128xf32> to vector<8x128xf32>
    %28 = arith.mulf %13, %27 : vector<8x128xf32>
    %29 = vector.broadcast %26 : vector<1x128xf32> to vector<8x128xf32>
    %30 = arith.addf %28, %29 : vector<8x128xf32>
    %cst_16 = arith.constant 0.000000e+00 : f32
    %31 = vector.broadcast %cst_16 : f32 to vector<8x128xf32>
    %32 = arith.maximumf %30, %31 : vector<8x128xf32>
    %cst_17 = arith.constant 0.000000e+00 : f32
    %33 = vector.broadcast %cst_17 : f32 to vector<8x128xf32>
    %34 = arith.select %7, %32, %33 : vector<8x128xi1>, vector<8x128xf32>
    %c0_18 = arith.constant 0 : index
    %c0_19 = arith.constant 0 : index
    %35 = vector.load %arg6[%c0_18, %c0_19] : memref<8x128xf32, #tpu.memory_space<vmem>>, vector<8x128xf32>
    tpu.vector_store %arg6[%c0_18, %c0_19], %34 {strides = array<i32>} : memref<8x128xf32, #tpu.memory_space<vmem>>, vector<8x128xf32>,
    return
  }
  func.func @transform_0(%arg0: i32) -> (i32, i32) {
    %c0_i32 = arith.constant 0 : i32
    %c0_i32_0 = arith.constant 0 : i32
    %c0_i32_1 = arith.constant 0 : i32
    return %c0_i32, %c0_i32_0 : i32, i32
  }
  func.func @transform_1(%arg0: i32) -> (i32, i32) {
    %c0_i32 = arith.constant 0 : i32
    %c0_i32_0 = arith.constant 0 : i32
    return %c0_i32, %arg0 : i32, i32
  }
  func.func @transform_2(%arg0: i32) -> (i32, i32) {
    %c0_i32 = arith.constant 0 : i32
    %c0_i32_0 = arith.constant 0 : i32
    return %c0_i32, %arg0 : i32, i32
  }
  func.func @transform_3(%arg0: i32) -> (i32, i32) {
    %c0_i32 = arith.constant 0 : i32
    %c0_i32_0 = arith.constant 0 : i32
    return %c0_i32, %arg0 : i32, i32
  }
  func.func @transform_4(%arg0: i32) -> (i32, i32) {
    %c0_i32 = arith.constant 0 : i32
    %c0_i32_0 = arith.constant 0 : i32
    return %c0_i32, %arg0 : i32, i32
  }
  func.func @transform_5(%arg0: i32) -> (i32, i32) {
    %c0_i32 = arith.constant 0 : i32
    %c0_i32_0 = arith.constant 0 : i32
    return %c0_i32, %arg0 : i32, i32
  }
}

</mosaic_0001>

<bundles_post_ra>
// kernel: tpu_custom_call.1
= control target key start
LH: loop header
LB: loop body
LE: loop exit
PB: predicated region body
PF: predicated region fallthrough
CT: control target
= control target key end

     0   :  { %s662_s0 = inlined_call_operand.<no memory space> [shape: s32[1], index: 0, kind: input, shape index: {}]   ;;  %s663_s1 = inlined_call_operand.hbm [shape: f32[8,128], index: 1, kind: input, shape index: {}]   ;;  %s664_s2 = inlined_call_operand.hbm [shape: f32[8,256], index: 2, kind: output, shape index: {}]  }
   0x1   :  { %7 = sst [smem:[#allocation2]] %s662_s0 }
   0x2   :  { %8 = vsyncpa [#allocation4], 0 }
   0x3   :  { %9 = vsyncpa [#allocation5], 0 }
   0x4   :  { %11 = vsyncpa [#allocation5 + $0x1], 0  ;;  %s514_s11 = smov 0   ;;  %s516_s12 = smov 0  }
   0x5   :  { %s518_s13 = smov 0   ;;  %s520_s14 = smov 0  }
   0x6 LB: > { %s535_s0 = sadd.s32 4294967295, %s492_s14   ;;  %s338_s15 = sadd.s32 4294967294, %s492_s14   ;;  %s492_s14 = sphi %s520_s14, %s680_s14   ;;  %s488_s13 = sphi %s518_s13, %s679_s13   ;;  %s484_s12 = sphi %s516_s12, %s678_s12   ;;  %s480_s11 = sphi %s514_s11, %s677_s11  }
   0x7   : > { %s539_s16 = sadd.s32 1, %s492_s14   ;;  %s66_s17 = sadd.s32 1, %s488_s13 }
   0x8   : > { %s63_s18 = ssub.s32 %s492_s14, %s539_s16  ;;  %p76_p0 = scmp.ne.s32.totalorder %s488_s13, %s484_s12 }
   0x9   : > { %p64_p1 = scmp.eq.s32.totalorder %s63_s18, 0  ;;  %p77_p2 = scmp.eq.s32.totalorder %s535_s0, 1 }
   0xa   : > { %p82_p3 = scmp.ne.s32.totalorder %s484_s12, %s480_s11  ;;  %p83_p4 = scmp.eq.s32.totalorder %s338_s15, 1 }
   0xb   : > { %s550_s19 = scalar_select %p64_p1, %s488_s13, %s66_s17  }
   0xc   : > { %p552_p5 = por %p77_p2, %p76_p0  ;;  %p556_p6 = por %p83_p4, %p82_p3 }
   0xd   : > { %p339_p7 = scmp.ge.s32.totalorder %s492_s14, 1  ;;  %p90_p8 = scmp.lt.s32.totalorder %s492_s14, 3 }
   0xe   : > { %s668_s20 = scalar_select %p552_p5, 1, 0 }
   0xf   : > { %s669_s21 = scalar_select %p556_p6, 1, 0 }
  0x10   : > { %p665_p9 = scmp.eq.s32.totalorder %s535_s0, 0  ;;  %p563_p10 = pnand %p339_p7, %p90_p8 }
  0x11   : > { %s494_s23 = smov [#allocation3]   ;;  %s398_s28 = scalar_lea.hbm %s663_s1, 128 }
  0x12   : > { %s670_s22 = scalar_select %p563_p10, 1, 0 }
  0x13   : > { %s106_s24 = sshll.u32 %s494_s23, 4  ;;  %p354_p11 = pneg %p563_p10  ;;  %s107_s24 = int_to_ptr.vmem [resolvable:$true] %s106_s24 }
  0x14   : > { %p399_p13 = scmp.ne.s32.totalorder %s663_s1, %s398_s28  ;;  %p405_p3 = scmp.lt.u32.totalorder %s398_s28, %s663_s1 }
  0x15   : > { %p571_p12 = pnand %p665_p9, %p354_p11 }
  0x17   : > { %p400_p0 = pneg %p571_p12 }
  0x19   : > { %p401_p1 = pnand %p400_p0, %p399_p13 }
  0x1b   : > { %p402_p2 = pneg %p401_p1 }
  0x1d   : > { %p407_p4 = pnand %p405_p3, %p402_p2 }
  0x1f   : > { %410 = shalt.err (!%p407_p4)
}
  0x20   : > { %s411_s5 = scalar_lea.vmem %s107_s24, 128  ;;  %p419_p9 = scmp.lt.s32.totalorder %s107_s24, %s107_s24 }
  0x21   : > { %p412_p7 = scmp.ne.s32.totalorder %s107_s24, %s411_s5  ;;  %p420_p6 = scmp.lt.s32.totalorder %s411_s5, %s411_s5 }
  0x23   : > { %p414_p8 = pnand %p412_p7, %p400_p0  ;;  %p421_p5 = por %p420_p6, %p419_p9 }
  0x25   : > { %p415_p11 = pneg %p414_p8 }
  0x27   : > { %p422_p10 = pnand %p421_p5, %p415_p11 }
  0x29   : > { %425 = shalt.err (!%p422_p10)
}
  0x2a   : > { %357 = dma.hbm_to_vmem [thread:$0]  (!%p571_p12), %s663_s1, 128, %s107_s24, [#allocation4]  }
  0x2b   : > { %p672_p13 = scmp.ne.s32.totalorder %s670_s22, 0 }
  0x2c   : > { %p673_p1 = scmp.eq.s32.totalorder (!%p672_p13), %s535_s0, 0 }
  0x2d   : > { %119 = sbr.rel (%p672_p13) target bundleno = 223 (0xdf), region = 28 }
  0x34   : > { %471 = dma.done.wait (%p673_p1), [#allocation4], 128   ;;  %p674_p0 = pmov %p673_p1 }
  0x35   : > { %s136_s8 = sld [smem:[#allocation2]]  ;;  %v138_v0 = vlaneseq  ;;  %s133_s10 = sand.u32 1, %s484_s12  }
  0x36   : > { %473 = vsyncadd (%p674_p0), [#allocation4], 4294967168  ;;  %s343_s15 = sshll.u32 %s133_s10, 3  ;;  %s345_s17 = sshll.u32 %s535_s0, 7 }
  0x37   : > { %s135_s18 = scalar_lea.vmem [#allocation6], %s343_s15  ;;  %s620_s25 = scalar_lea.hbm %s664_s2, %s345_s17 }
  0x38   : > { %s279_s22 = sshll.u32 %s135_s18, 4  ;;  %s266_s26 = scalar_lea.sflag [#allocation5], %s133_s10  ;;  %s622_s22 = int_to_ptr.vmem [resolvable:$true] %s279_s22 }
  0x39   : > { %p675_p6 = scmp.ne.s32.totalorder %s668_s20, 0  ;;  %s495_s27 = smov [#allocation6]  }
  0x3a   : > { %s430_s28 = sshll.u32 %s495_s27, 4  ;;  %s431_s28 = int_to_ptr.vmem [resolvable:$false] %s430_s28 }
  0x3b   : > { %s137_s9 = sadd.s32 %s535_s0, %s136_s8  ;;  %s426_s0 = scalar_lea.vmem %s622_s22, 128 }
  0x3c   : > { %v598_v1 = vstv %s137_s9  ;;  %p427_p5 = scmp.ne.s32.totalorder %s622_s22, %s426_s0  ;;  %s432_s29 = scalar_lea.vmem %s431_s28, 256 }
  0x3d   : > { %v142_v2 = vadd.s32 %v598_v1, %v138_v0  ;;  %v140_v18 = vxor.u32 %v598_v1, %v598_v1  ;;  %p433_p12 = scmp.lt.s32.totalorder %s622_s22, %s431_s28  ;;  %p434_p2 = scmp.lt.s32.totalorder %s432_s29, %s426_s0 }
  0x3e   : > { %p428_p9 = pnand %p427_p5, %p675_p6 }
  0x3f   : > { %v143_v3 = vadd.s32 %v142_v2, %v142_v2  ;;  %v144_v4 = vshll.u32 %v142_v2, 13  ;;  %v145_v5 = vshrl.u32 %v142_v2, 19  ;;  %v603_v22 = vxor.u32 466688986, %v140_v18  ;;  %p435_p3 = por %p434_p2, %p433_p12 }
  0x40   : > { %p429_p10 = pneg %p428_p9 }
  0x41   : > { %v146_v6 = vor.u32 %v145_v5, %v144_v4 }
  0x42   : > { %p436_p4 = pnand %p435_p3, %p429_p10 }
  0x43   : > { %v147_v7 = vxor.u32 %v146_v6, %v143_v3 }
  0x45   : > { %v148_v8 = vadd.s32 %v147_v7, %v143_v3  ;;  %v149_v9 = vshll.u32 %v147_v7, 15  ;;  %v150_v10 = vshrl.u32 %v147_v7, 17 }
  0x47   : > { %v151_v11 = vor.u32 %v150_v10, %v149_v9 }
  0x49   : > { %v152_v12 = vxor.u32 %v151_v11, %v148_v8 }
  0x4b   : > { %v153_v13 = vadd.s32 %v152_v12, %v148_v8  ;;  %v154_v14 = vshll.u32 %v152_v12, 26  ;;  %v155_v15 = vshrl.u32 %v152_v12, 6 }
  0x4d   : > { %v156_v16 = vor.u32 %v155_v15, %v154_v14 }
  0x4f   : > { %v157_v17 = vxor.u32 %v156_v16, %v153_v13 }
  0x51   : > { %v158_v19 = vadd.s32 %v157_v17, %v153_v13  ;;  %v159_v20 = vshll.u32 %v157_v17, 6  ;;  %v160_v21 = vshrl.u32 %v157_v17, 26 }
  0x53   : > { %v161_v23 = vor.u32 %v160_v21, %v159_v20  ;;  %v163_v25 = vadd.s32 %v158_v19, %v598_v1 }
  0x55   : > { %v162_v24 = vxor.u32 %v161_v23, %v158_v19 }
  0x57   : > { %v164_v26 = vadd.s32 %v162_v24, %v603_v22 }
  0x59   : > { %v165_v27 = vadd.s32 1, %v164_v26 }
  0x5b   : > { %v166_v28 = vadd.s32 %v165_v27, %v163_v25  ;;  %v167_v29 = vshll.u32 %v165_v27, 17  ;;  %v168_v30 = vshrl.u32 %v165_v27, 15 }
  0x5d   : > { %v169_v31 = vor.u32 %v168_v30, %v167_v29 }
  0x5f   : > { %v170_v32 = vxor.u32 %v169_v31, %v166_v28 }
  0x61   : > { %v171_v33 = vadd.s32 %v170_v32, %v166_v28  ;;  %v172_v34 = vshll.u32 %v170_v32, 29  ;;  %v173_v35 = vshrl.u32 %v170_v32, 3 }
  0x63   : > { %v174_v36 = vor.u32 %v173_v35, %v172_v34 }
  0x65   : > { %v175_v37 = vxor.u32 %v174_v36, %v171_v33 }
  0x67   : > { %v176_v38 = vadd.s32 %v175_v37, %v171_v33  ;;  %v177_v39 = vshll.u32 %v175_v37, 16  ;;  %v178_v40 = vshrl.u32 %v175_v37, 16 }
  0x69   : > { %v179_v41 = vor.u32 %v178_v40, %v177_v39 }
  0x6b   : > { %v180_v42 = vxor.u32 %v179_v41, %v176_v38 }
  0x6d   : > { %v181_v43 = vadd.s32 %v180_v42, %v176_v38  ;;  %v182_v44 = vshll.u32 %v180_v42, 24  ;;  %v183_v45 = vshrl.u32 %v180_v42, 8 }
  0x6f   : > { %v184_v46 = vor.u32 %v183_v45, %v182_v44  ;;  %v186_v48 = vadd.s32 %v181_v43, %v603_v22 }
  0x71   : > { %v185_v47 = vxor.u32 %v184_v46, %v181_v43 }
  0x73   : > { %v187_v49 = vadd.s32 %v185_v47, %v598_v1 }
  0x75   : > { %v188_v50 = vadd.s32 2, %v187_v49 }
  0x77   : > { %v189_v51 = vadd.s32 %v188_v50, %v186_v48  ;;  %v190_v52 = vshll.u32 %v188_v50, 13  ;;  %v191_v53 = vshrl.u32 %v188_v50, 19 }
  0x79   : > { %v192_v54 = vor.u32 %v191_v53, %v190_v52 }
  0x7b   : > { %v193_v55 = vxor.u32 %v192_v54, %v189_v51 }
  0x7d   : > { %v194_v56 = vadd.s32 %v193_v55, %v189_v51  ;;  %v195_v57 = vshll.u32 %v193_v55, 15  ;;  %v196_v58 = vshrl.u32 %v193_v55, 17 }
  0x7f   : > { %v197_v59 = vor.u32 %v196_v58, %v195_v57 }
  0x81   : > { %v198_v60 = vxor.u32 %v197_v59, %v194_v56  ;;  %v262_v59 = vld [vmem:[#allocation3] sm:$0xff] }
  0x83   : > { %v199_v61 = vadd.s32 %v198_v60, %v194_v56  ;;  %v200_v62 = vshll.u32 %v198_v60, 26  ;;  %v201_v63 = vshrl.u32 %v198_v60, 6 }
  0x85   : > { %v202_v0 = vor.u32 %v201_v63, %v200_v62 }
  0x87   : > { %v203_v2 = vxor.u32 %v202_v0, %v199_v61 }
  0x89   : > { %v204_v3 = vadd.s32 %v203_v2, %v199_v61  ;;  %v205_v4 = vshll.u32 %v203_v2, 6  ;;  %v206_v5 = vshrl.u32 %v203_v2, 26 }
  0x8b   : > { %v207_v6 = vor.u32 %v206_v5, %v205_v4  ;;  %v209_v8 = vadd.s32 %v204_v3, %v598_v1 }
  0x8d   : > { %v208_v7 = vxor.u32 %v207_v6, %v204_v3 }
  0x8f   : > { %v210_v9 = vadd.s32 %v208_v7, %v598_v1 }
  0x91   : > { %v211_v10 = vadd.s32 3, %v210_v9 }
  0x93   : > { %v212_v11 = vadd.s32 %v211_v10, %v209_v8  ;;  %v213_v12 = vshll.u32 %v211_v10, 17  ;;  %v214_v13 = vshrl.u32 %v211_v10, 15 }
  0x95   : > { %v215_v14 = vor.u32 %v214_v13, %v213_v12 }
  0x97   : > { %v216_v15 = vxor.u32 %v215_v14, %v212_v11 }
  0x99   : > { %v217_v16 = vadd.s32 %v216_v15, %v212_v11  ;;  %v218_v17 = vshll.u32 %v216_v15, 29  ;;  %v219_v18 = vshrl.u32 %v216_v15, 3 }
  0x9b   : > { %v220_v19 = vor.u32 %v219_v18, %v218_v17 }
  0x9d   : > { %v221_v20 = vxor.u32 %v220_v19, %v217_v16 }
  0x9f   : > { %v222_v21 = vadd.s32 %v221_v20, %v217_v16  ;;  %v223_v23 = vshll.u32 %v221_v20, 16  ;;  %v224_v24 = vshrl.u32 %v221_v20, 16 }
  0xa1   : > { %v225_v25 = vor.u32 %v224_v24, %v223_v23 }
  0xa3   : > { %v226_v26 = vxor.u32 %v225_v25, %v222_v21 }
  0xa5   : > { %v227_v27 = vadd.s32 %v226_v26, %v222_v21  ;;  %v228_v28 = vshll.u32 %v226_v26, 24  ;;  %v229_v29 = vshrl.u32 %v226_v26, 8 }
  0xa7   : > { %v230_v30 = vor.u32 %v229_v29, %v228_v28  ;;  %v232_v32 = vadd.s32 %v227_v27, %v598_v1 }
  0xa9   : > { %v231_v31 = vxor.u32 %v230_v30, %v227_v27 }
  0xab   : > { %v233_v33 = vadd.s32 %v231_v31, %v603_v22 }
  0xad   : > { %v234_v34 = vadd.s32 4, %v233_v33 }
  0xaf   : > { %v235_v35 = vadd.s32 %v234_v34, %v232_v32  ;;  %v236_v36 = vshll.u32 %v234_v34, 13  ;;  %v237_v37 = vshrl.u32 %v234_v34, 19 }
  0xb1   : > { %v238_v38 = vor.u32 %v237_v37, %v236_v36 }
  0xb3   : > { %v239_v39 = vxor.u32 %v238_v38, %v235_v35 }
  0xb5   : > { %v240_v40 = vadd.s32 %v239_v39, %v235_v35  ;;  %v241_v41 = vshll.u32 %v239_v39, 15  ;;  %v242_v42 = vshrl.u32 %v239_v39, 17 }
  0xb7   : > { %v243_v43 = vor.u32 %v242_v42, %v241_v41 }
  0xb9   : > { %v244_v44 = vxor.u32 %v243_v43, %v240_v40 }
  0xbb   : > { %v245_v45 = vadd.s32 %v244_v44, %v240_v40  ;;  %v246_v46 = vshll.u32 %v244_v44, 26  ;;  %v247_v47 = vshrl.u32 %v244_v44, 6 }
  0xbd   : > { %v248_v48 = vor.u32 %v247_v47, %v246_v46 }
  0xbf   : > { %v249_v49 = vxor.u32 %v248_v48, %v245_v45 }
  0xc1   : > { %v250_v50 = vadd.s32 %v249_v49, %v245_v45  ;;  %v251_v51 = vshll.u32 %v249_v49, 6  ;;  %v252_v52 = vshrl.u32 %v249_v49, 26 }
  0xc3   : > { %v253_v53 = vor.u32 %v252_v52, %v251_v51  ;;  %v255_v55 = vadd.s32 %v250_v50, %v603_v22 }
  0xc5   : > { %v254_v54 = vxor.u32 %v253_v53, %v250_v50 }
  0xc7   : > { %v256_v56 = vadd.s32 %v254_v54, %v598_v1 }
  0xc9   : > { %v257_v57 = vadd.s32 5, %v256_v56 }
  0xcb   : > { %v258_v58 = vxor.u32 %v257_v57, %v255_v55 }
  0xcd   : > { %259 = set.rngseed %v258_v58 }
  0xce   : > { %v260_v60 = vrng }
  0xcf   : > { %vm261_vm0 = vcmp.lt.u32.totalorder %v260_v60, 3865470566 }
  0xd0   : > { %v263_v1 = vsel %vm261_vm0, %v262_v59, 0.0 }
  0xd1   : > { %264 = vst [vmem:[%s135_s18] sm:$0xff] %v263_v1 }
  0xd2   : > { %439 = shalt.err (!%p436_p4)
}
  0xd3   : > { %s440_s30 = scalar_lea.hbm %s620_s25, 128  ;;  %s444_s5 = scalar_lea.hbm %s664_s2, 256 }
  0xd4   : > { %p441_p7 = scmp.ne.s32.totalorder %s620_s25, %s440_s30  ;;  %p445_p13 = scmp.lt.u32.totalorder %s620_s25, %s664_s2 }
  0xd5   : > { %p446_p1 = scmp.lt.u32.totalorder %s444_s5, %s440_s30  ;;  %p448_p5 = scmp.lt.u32.totalorder %s440_s30, %s620_s25 }
  0xd6   : > { %p442_p8 = pnand %p441_p7, %p675_p6 }
  0xd7   : > { %p447_p0 = por %p446_p1, %p445_p13 }
  0xd8   : > { %p443_p11 = pneg %p442_p8 }
  0xd9   : > { %p449_p9 = por %p448_p5, %p447_p0 }
  0xdb   : > { %p450_p10 = pnand %p449_p9, %p443_p11 }
  0xdd   : > { %453 = shalt.err (!%p450_p10)
}
  0xde   : > { %352 = dma.vmem_to_hbm [thread:$0]  (%p675_p6), %s622_s22, 128, %s620_s25, %s266_s26  }
  0xdf PF: > { %p364_p12 = scmp.ge.s32.totalorder %s492_s14, 2  ;;  %s291_s8 = sand.u32 1, %s480_s11  }
  0xe0   : > { %p676_p2 = scmp.ne.s32.totalorder %s669_s21, 0  ;;  %s292_s9 = scalar_lea.sflag [#allocation5], %s291_s8 }
  0xe2   : > { %p359_p3 = pnand %p364_p12, %p676_p2 }
  0xe4   : > { %475 = dma.done.wait (!%p359_p3), %s292_s9, 128  }
  0xe5   : > { %477 = vsyncadd (!%p359_p3), %s292_s9, 4294967168  ;;  %p14_p4 = scmp.ge.s32.totalorder %s539_s16, 4   ;;  %s677_s11 = smov %s484_s12 }
  0xe6   : > { %s678_s12 = smov %s488_s13  ;;  %s679_s13 = smov %s550_s19 }
  0xe7   : > { %s680_s14 = smov %s539_s16  ;;  %16 = sbr.rel (!%p14_p4) target bundleno = 6 (0x6), region = 65 }
  0xee   :  { %297 = vsyncpa [#allocation4], 1 }
  0xef   :  { %299 = vsyncpa [#allocation4 + $0x1], 1 }
  0xf0   :  { %300 = vsyncpa [#allocation5], 1 }
  0xf1   :  { %302 = vsyncpa [#allocation5 + $0x1], 1 }

// kernel: tpu_custom_call.1
= control target key start
LH: loop header
LB: loop body
LE: loop exit
PB: predicated region body
PF: predicated region fallthrough
CT: control target
= control target key end

     0   :  { %10 = vsyncpa [#allocation3], 0  ;;  %s353_s0 = inlined_call_operand.hbm [shape: bf16[8,32], index: 0, kind: input, shape index: {}]   ;;  %s354_s1 = inlined_call_operand.hbm [shape: bf16[32,128], index: 1, kind: input, shape index: {}]   ;;  %s355_s2 = inlined_call_operand.vmem [shape: f32[1,128], index: 2, kind: input, shape index: {}]   ;;  %s356_s3 = inlined_call_operand.vmem [shape: f32[1,128], index: 3, kind: input, shape index: {}]   ;;  %s357_s4 = inlined_call_operand.vmem [shape: u32[8,128], index: 4, kind: input, shape index: {}]   ;;  %s358_s5 = inlined_call_operand.hbm [shape: f32[8,128], index: 5, kind: output, shape index: {}]  }
   0x1   :  { %11 = vsyncpa [#allocation6], 0 }
   0x2   :  { %12 = vsyncpa [#allocation4], 0  ;;  %s264_s18 = smov [#allocation2]   ;;  %s265_s20 = smov [#allocation5]  }
   0x3   :  { %s19_s19 = sshll.u32 %s264_s18, 4  ;;  %s28_s21 = sshll.u32 %s265_s20, 4  ;;  %s20_s19 = int_to_ptr.vmem [resolvable:$true] %s19_s19  ;;  %s301_s21 = int_to_ptr.vmem [resolvable:$true] %s28_s21 }
   0x4   :  { %s192_s24 = scalar_lea.hbm %s353_s0, 64 }
   0x5   :  { %p193_p0 = scmp.ne.s32.totalorder %s353_s0, %s192_s24  ;;  %p196_p1 = scmp.lt.u32.totalorder %s192_s24, %s353_s0 }
   0x7   :  { %p198_p2 = pnand %p196_p1, %p193_p0 }
   0x9   :  { %201 = shalt.err (!%p198_p2)
}
   0xa   :  { %s202_s29 = scalar_lea.vmem %s20_s19, 64  ;;  %p207_p4 = scmp.lt.s32.totalorder %s20_s19, %s20_s19 }
   0xb   :  { %p203_p3 = scmp.ne.s32.totalorder %s20_s19, %s202_s29  ;;  %p208_p5 = scmp.lt.s32.totalorder %s202_s29, %s202_s29 }
   0xd   :  { %p209_p6 = por %p208_p5, %p207_p4 }
   0xf   :  { %p210_p7 = pnand %p209_p6, %p203_p3 }
  0x11   :  { %213 = shalt.err (!%p210_p7)
}
  0x12   :  { %22 = dma.hbm_to_vmem [thread:$0]  %s353_s0, 64, %s20_s19, [#allocation3]  }
  0x13   :  { %s214_s9 = scalar_lea.hbm %s354_s1, 256 }
  0x14   :  { %p215_p8 = scmp.ne.s32.totalorder %s354_s1, %s214_s9  ;;  %p218_p9 = scmp.lt.u32.totalorder %s214_s9, %s354_s1 }
  0x16   :  { %p220_p10 = pnand %p218_p9, %p215_p8 }
  0x18   :  { %223 = shalt.err (!%p220_p10)
}
  0x19   :  { %s224_s14 = scalar_lea.vmem %s301_s21, 256  ;;  %p229_p12 = scmp.lt.s32.totalorder %s301_s21, %s301_s21 }
  0x1a   :  { %p225_p11 = scmp.ne.s32.totalorder %s301_s21, %s224_s14  ;;  %p230_p13 = scmp.lt.s32.totalorder %s224_s14, %s224_s14 }
  0x1c   :  { %p231_p0 = por %p230_p13, %p229_p12 }
  0x1e   :  { %p232_p1 = pnand %p231_p0, %p225_p11 }
  0x20   :  { %235 = shalt.err (!%p232_p1)
}
  0x21   :  { %s266_s0 = smov 64   ;;  %s267_s15 = smov 4  }
  0x22   :  { %34 = dma.hbm_to_vmem [thread:$0]  %s354_s1, 256, %s301_s21, [#allocation6], %s266_s0, %s266_s0, %s267_s15  }
  0x23   :  { %258 = dma.done.wait [#allocation3], 64  }
  0x24   :  { %259 = vsyncadd [#allocation3], 4294967232 }
  0x25   :  { %260 = dma.done.wait [#allocation6], 256  }
  0x26   :  { %261 = vsyncadd [#allocation6], 4294967040  ;;  %v268_v0 = vmov 0.0   ;;  %vm269_vm0 = vmmov 0   ;;  %v188_v1 = vld [vmem:[#allocation5] sm:$0xff]   ;;  %v189_v2 = vld [vmem:[#allocation5 + $0x8] sm:$0xff]   ;;  %v135_v25 = vlaneseq }
  0x27   :  { %173 = vmatprep.subr.bf16.mxu0 %v268_v0  ;;  %177 = vmatprep.mubr.msk.bf16.mxu0 %vm269_vm0, %v268_v0  ;;  %v48_v3 = vld [vmem:[#allocation2] sm:$0xf]  ;;  %vm65_vm1 = vcmask 261120   ;;  %v109_v27 = vld [vmem:[%s355_s2] sm:$0x1]  ;;  %s270_s23 = smov [#allocation7]  }
  0x28   :  { %174 = vmatpush3.bf16.msra.mxu0 %v188_v1  ;;  %v136_v26 = vshrl.u32 %v135_v25, 7  ;;  %v110_v28 = vld [vmem:[%s356_s3] sm:$0x1]  ;;  %s157_s24 = sshll.u32 %s270_s23, 4  ;;  %s158_s24 = int_to_ptr.vmem [resolvable:$true] %s157_s24 }
  0x29   :  { %175 = vmatprep.subr.bf16.mxu0 %v268_v0  ;;  %v133_v32 = vmul.f32 1.1111112, %v110_v28  ;;  %v111_v37 = vld [vmem:[%s357_s4] sm:$0xff]  ;;  %s236_s2 = scalar_lea.vmem %s158_s24, 128  ;;  %p241_p3 = scmp.lt.s32.totalorder %s158_s24, %s158_s24 }
  0x2a   :  { %v137_v31 = vsub.s32 0, %v136_v26  ;;  %vm112_vm2 = vcmp.lt.u32.totalorder %v111_v37, 3865470566  ;;  %p237_p2 = scmp.ne.s32.totalorder %s158_s24, %s236_s2  ;;  %p242_p4 = scmp.lt.s32.totalorder %s236_s2, %s236_s2 }
  0x2c   :  { %176 = vmatpush3.bf16.msra.mxu0 %v189_v2  ;;  %v145_v35 = vrot.slane %v133_v32, %v137_v31  ;;  %p243_p5 = por %p242_p4, %p241_p3 }
  0x2e   :  { %p244_p6 = pnand %p243_p5, %p237_p2 }
  0x2f   :  { %178 = vmatmul.mubr.msk.bf16.vlgmr.msra.gmra.mrb[0].mxu0 %vm65_vm1, %v48_v3 }
 0x102   :  { %v103_v4 = vpop.f32.mrb[0].mxu0 }
 0x103   :  { %v113_v5 = vrot.slane %v103_v4, 4  ;;  %v179_v6 = vpop.f32.mrb[1].mxu0 }
 0x104   :  { %v106_v7 = vpop.f32.mrb[2].mxu0 }
 0x105   :  { %v114_v8 = vadd.f32 %v113_v5, %v103_v4  ;;  %v180_v9 = vpop.f32.mrb[3].mxu0 }
 0x107   :  { %v115_v10 = vrot.slane %v114_v8, 2 }
 0x109   :  { %v116_v11 = vadd.f32 %v115_v10, %v114_v8 }
 0x10b   :  { %v117_v12 = vrot.slane %v116_v11, 1 }
 0x10d   :  { %v118_v13 = vadd.f32 %v117_v12, %v116_v11 }
 0x10f   :  { %v119_v14 = vmul.f32 0.125, %v118_v13 }
 0x111   :  { %v120_v15 = vsub.f32 %v103_v4, %v119_v14 }
 0x113   :  { %v121_v16 = vmul.f32 %v120_v15, %v120_v15 }
 0x115   :  { %v122_v17 = vrot.slane %v121_v16, 4 }
 0x117   :  { %v123_v18 = vadd.f32 %v122_v17, %v121_v16 }
 0x119   :  { %v124_v19 = vrot.slane %v123_v18, 2 }
 0x11b   :  { %v125_v20 = vadd.f32 %v124_v19, %v123_v18 }
 0x11d   :  { %v126_v21 = vrot.slane %v125_v20, 1 }
 0x11f   :  { %v127_v22 = vadd.f32 %v126_v21, %v125_v20 }
 0x121   :  { %v128_v23 = vmul.f32 0.125, %v127_v22 }
 0x123   :  { %v129_v24 = vadd.f32 1e-05, %v128_v23 }
 0x125   :  { %190 = vrsqrt.f32 %v129_v24 }
 0x12f   :  { %v191_v29 = vpop.eup %190 }
 0x130   :  { %v131_v30 = vmul.f32 %v191_v29, %v109_v27 }
 0x132   :  { %v132_v33 = vmul.f32 1.1111112, %v131_v30 }
 0x134   :  { %v138_v34 = vrot.slane %v132_v33, %v137_v31 }
 0x136   :  { %v140_v36 = vmul.f32 %v138_v34, %v120_v15 }
 0x138   :  { %v147_v38 = vadd.f32 %v145_v35, %v140_v36 }
 0x13a   :  { %v148_v39 = vmax.f32 %v147_v38, 0.0 }
 0x13c   :  { %v149_v40 = vsel %vm112_vm2, %v148_v39, 0.0 }
 0x13d   :  { %150 = vst [vmem:[#allocation7] sm:$0xff] %v149_v40 }
 0x13e   :  { %247 = shalt.err (!%p244_p6)
}
 0x13f   :  { %s248_s26 = scalar_lea.hbm %s358_s5, 128 }
 0x140   :  { %p249_p7 = scmp.ne.s32.totalorder %s358_s5, %s248_s26  ;;  %p252_p8 = scmp.lt.u32.totalorder %s248_s26, %s358_s5 }
 0x142   :  { %p254_p9 = pnand %p252_p8, %p249_p7 }
 0x144   :  { %257 = shalt.err (!%p254_p9)
}
 0x145   :  { %160 = dma.vmem_to_hbm [thread:$0]  %s158_s24, 128, %s358_s5, [#allocation4]  }
 0x146   :  { %262 = dma.done.wait [#allocation4], 128  }
 0x147   :  { %263 = vsyncadd [#allocation4], 4294967168 }
 0x148   :  { %164 = vsyncpa [#allocation3], 1 }
 0x149   :  { %165 = vsyncpa [#allocation6], 1 }
 0x14a   :  { %166 = vsyncpa [#allocation4], 1 }

</bundles_post_ra>
